<compile_context>
chip_gen: v7x
topology: tpu7x:2x2x1
jax: 0.10.0
libtpu: 0.0.40
codegen_flags: <defaults>
</compile_context>

<pallas_src>
import jax
import jax.numpy as jnp
from jax.experimental import pallas as pl
from jax.experimental.pallas import tpu as pltpu


def _folded_linear_kernel(x_ref, w_ref, b_ref, o_ref):
    # Hot path: one MXU matmul per row tile (f32 accumulate) + VPU bias add.
    x = x_ref[...]                                        # [tm, fold*emb_dim]
    w = w_ref[...]                                        # [fold*emb_dim, fold*3]
    acc = jnp.dot(x, w, preferred_element_type=jnp.float32)
    o_ref[...] = (acc + b_ref[...]).astype(o_ref.dtype)   # b: [1, fold*3] f32


def dist_angle_coords_forward(xs, weight, bias, *,
                              block_rows=4096,
                              min_pallas_rows=1024):
    """Pallas implementation of DistAngleCoords.forward.

    xs:     [N, emb_dim]   (float32 or bfloat16)
    weight: [3, emb_dim]   float32  (PyTorch nn.Linear layout)
    bias:   [3]            float32
    returns [N, 3]         xs.dtype

    block_rows:      folded-row tile size.  At 4096 the per-step footprint is
                     ~2.2 MiB (x2 for double buffering), comfortably inside the
                     default scoped VMEM on every chip (incl. v7x's 64 MiB).
    min_pallas_rows: below this N, dispatch plain XLA (launch overhead wins).
    """
    n, emb_dim = xs.shape
    out_dim = weight.shape[0]                             # 3
    w_t = weight.T.astype(xs.dtype)                       # [emb_dim, 3]

    if n == 0 or n < min_pallas_rows:
        # Tiny problem: a single XLA fused matmul beats kernel dispatch overhead.
        return (xs @ w_t + bias.astype(jnp.float32)).astype(xs.dtype)

    # Fold several logical rows into one 128-lane vector row when possible.
    fold = (128 // emb_dim) if (emb_dim <= 128 and 128 % emb_dim == 0) else 1

    # Pad only the ragged tail so rows fold evenly (at most fold-1 rows).
    rem = n % fold
    n_fold = n + ((fold - rem) % fold)
    xs_p = xs if n_fold == n else jnp.pad(xs, ((0, n_fold - n), (0, 0)))
    nf = n_fold // fold                                   # folded rows
    xs_f = xs_p.reshape(nf, fold * emb_dim)               # free (row-major) reshape

    # Block-diagonal weight: out[:, q*3+l] = xs_row_q @ W^T[:, l].
    if fold > 1:
        w_f = jnp.kron(jnp.eye(fold, dtype=w_t.dtype), w_t)   # [fold*emb, fold*3]
    else:
        w_f = w_t
    b_f = jnp.tile(bias.reshape(1, out_dim), (1, fold)).astype(jnp.float32)

    # Row tile: one full block when small (block dims == array dims is always
    # legal), otherwise an 8-aligned tile with a cdiv grid; Pallas masks the
    # partial last tile (OOB output rows are discarded), so no big pad copy.
    if nf <= block_rows:
        tm = nf
        grid = (1,)
    else:
        tm = max(8, (block_rows // 8) * 8)
        grid = (pl.cdiv(nf, tm),)

    out_f = pl.pallas_call(
        _folded_linear_kernel,
        out_shape=jax.ShapeDtypeStruct((nf, fold * out_dim), xs.dtype),
        grid=grid,
        in_specs=[
            # xs tile marches down the rows; (tm, 128) satisfies (8,128) tiling.
            pl.BlockSpec((tm, fold * emb_dim), lambda i: (i, 0)),
            # weight / bias: constant index_map -> fetched once, VMEM-resident.
            pl.BlockSpec((fold * emb_dim, fold * out_dim), lambda i: (0, 0)),
            pl.BlockSpec((1, fold * out_dim), lambda i: (0, 0)),
        ],
        out_specs=pl.BlockSpec((tm, fold * out_dim), lambda i: (i, 0)),
        compiler_params=pltpu.CompilerParams(
            dimension_semantics=("parallel",)),
    )(xs_f, w_f, b_f)

    # Unfold [nf, fold*3] -> [n_fold, 3] (free reshape) and drop the tail pad.
    out = out_f.reshape(n_fold, out_dim)
    if n_fold != n:
        out = out[:n]
    return out


if __name__ == "__main__":
    key = jax.random.PRNGKey(0)
    k_x, k_w, k_b = jax.random.split(key, 3)

    emb_dim = 32     # hidden size of the module
    n_nodes = 1003   # deliberately not a multiple of 4/8: exercises tail pad + partial tile

    xs = jax.random.normal(k_x, (n_nodes, emb_dim), dtype=jnp.float32)

    # Deterministic parameter init mirroring torch.nn.Linear's uniform bound.
    bound = 1.0 / jnp.sqrt(jnp.float32(emb_dim))
    weight = jax.random.uniform(k_w, (3, emb_dim), jnp.float32, -bound, bound)
    bias = jax.random.uniform(k_b, (3,), jnp.float32, -bound, bound)

    ref = xs @ weight.T + bias

    # Multi-tile path: small row tile -> 4 grid steps, last tile partial.
    out = dist_angle_coords_forward(
        xs, weight, bias, block_rows=64, min_pallas_rows=0)
    out = jax.block_until_ready(out)
    assert out.shape == (n_nodes, 3)
    assert jnp.allclose(out, ref, atol=1e-4, rtol=1e-4), float(
        jnp.max(jnp.abs(out - ref)))

    # Single-block path (whole folded array in one tile).
    out1 = dist_angle_coords_forward(
        xs, weight, bias, block_rows=4096, min_pallas_rows=0)
    out1 = jax.block_until_ready(out1)
    assert jnp.allclose(out1, ref, atol=1e-4, rtol=1e-4)

    # Tiny-N plain-XLA fallback path gives the same answer.
    out_small = dist_angle_coords_forward(xs[:16], weight, bias)
    assert jnp.allclose(out_small, ref[:16], atol=1e-4, rtol=1e-4)

    print("KERNEL_OK")
</pallas_src>

<mosaic_0001>
module attributes {stable_mosaic.version = 11 : i64} {
  func.func @_folded_linear_kernel(%arg0: i32, %arg1: memref<64x128xf32, #tpu.memory_space<vmem>>, %arg2: memref<128x12xf32, #tpu.memory_space<vmem>>, %arg3: memref<1x12xf32, #tpu.memory_space<vmem>>, %arg4: memref<64x12xf32, #tpu.memory_space<vmem>>) attributes {dimension_semantics = [#tpu.dimension_semantics<parallel>], iteration_bounds = array<i64: 4>, scalar_prefetch = 0 : i64, scratch_operands = 0 : i64, tpu.core_type = #tpu.core_type<tc>, window_params = [{transform_indices = @transform_0, window_bounds = array<i64: 64, 128>}, {pipeline_mode = #tpu.pipeline_mode<synchronous>, transform_indices = @transform_1, window_bounds = array<i64: 128, 12>}, {pipeline_mode = #tpu.pipeline_mode<synchronous>, transform_indices = @transform_2, window_bounds = array<i64: 1, 12>}, {transform_indices = @transform_3, window_bounds = array<i64: 64, 12>}]} {
    %c0 = arith.constant 0 : index
    %c0_0 = arith.constant 0 : index
    %0 = vector.load %arg1[%c0, %c0_0] : memref<64x128xf32, #tpu.memory_space<vmem>>, vector<64x128xf32>
    %c0_1 = arith.constant 0 : index
    %c0_2 = arith.constant 0 : index
    %1 = vector.load %arg2[%c0_1, %c0_2] : memref<128x12xf32, #tpu.memory_space<vmem>>, vector<128x12xf32>
    %cst = arith.constant dense<0.000000e+00> : vector<64x12xf32>
    %2 = tpu.matmul %0, %1, %cst {dimension_numbers = #tpu.dot_dimension_numbers<[1], [0], [0], [1], [0, 0, 1, 1], [], []>} : vector<64x128xf32>, vector<128x12xf32>, vector<64x12xf32> -> vector<64x12xf32>
    %c0_3 = arith.constant 0 : index
    %c0_4 = arith.constant 0 : index
    %3 = vector.load %arg3[%c0_3, %c0_4] : memref<1x12xf32, #tpu.memory_space<vmem>>, vector<1x12xf32>
    %4 = vector.broadcast %3 : vector<1x12xf32> to vector<64x12xf32>
    %5 = arith.addf %2, %4 : vector<64x12xf32>
    %c0_5 = arith.constant 0 : index
    %c0_6 = arith.constant 0 : index
    %6 = vector.load %arg4[%c0_5, %c0_6] : memref<64x12xf32, #tpu.memory_space<vmem>>, vector<64x12xf32>
    tpu.vector_store %arg4[%c0_5, %c0_6], %5 {strides = array<i32>} : memref<64x12xf32, #tpu.memory_space<vmem>>, vector<64x12xf32>,
    return
  }
  func.func @transform_0(%arg0: i32) -> (i32, i32) {
    %c0_i32 = arith.constant 0 : i32
    %c0_i32_0 = arith.constant 0 : i32
    return %arg0, %c0_i32 : i32, i32
  }
  func.func @transform_1(%arg0: i32) -> (i32, i32) {
    %c0_i32 = arith.constant 0 : i32
    %c0_i32_0 = arith.constant 0 : i32
    %c0_i32_1 = arith.constant 0 : i32
    return %c0_i32, %c0_i32_0 : i32, i32
  }
  func.func @transform_2(%arg0: i32) -> (i32, i32) {
    %c0_i32 = arith.constant 0 : i32
    %c0_i32_0 = arith.constant 0 : i32
    %c0_i32_1 = arith.constant 0 : i32
    return %c0_i32, %c0_i32_0 : i32, i32
  }
  func.func @transform_3(%arg0: i32) -> (i32, i32) {
    %c0_i32 = arith.constant 0 : i32
    %c0_i32_0 = arith.constant 0 : i32
    return %arg0, %c0_i32 : i32, i32
  }
}

</mosaic_0001>

<bundles_post_ra>
// kernel: tpu_custom_call.1
= control target key start
LH: loop header
LB: loop body
LE: loop exit
PB: predicated region body
PF: predicated region fallthrough
CT: control target
= control target key end

     0   :  { %8 = vsyncpa [#allocation3], 0  ;;  %s842_s0 = inlined_call_operand.hbm [shape: f32[251,128], index: 0, kind: input, shape index: {}]   ;;  %s843_s1 = inlined_call_operand.vmem [shape: f32[128,12], index: 1, kind: input, shape index: {}]   ;;  %s844_s2 = inlined_call_operand.vmem [shape: f32[1,12], index: 2, kind: input, shape index: {}]   ;;  %s845_s3 = inlined_call_operand.vmem [shape: f32[251,12], index: 3, kind: output, shape index: {}]  }
   0x1   :  { %10 = vsyncpa [#allocation3 + $0x1], 0  ;;  %s666_s12 = smov 0   ;;  %s668_s13 = smov 0  }
   0x2   :  { %s670_s14 = smov 0   ;;  %s672_s15 = smov 0  }
   0x3 LB: > { %s405_s16 = sadd.s32 4294967295, %s641_s15   ;;  %s686_s17 = sadd.s32 1, %s641_s15   ;;  %s641_s15 = sphi %s672_s15, %s852_s15   ;;  %s637_s14 = sphi %s670_s14, %s851_s14   ;;  %s633_s13 = sphi %s668_s13, %s850_s13   ;;  %s629_s12 = sphi %s666_s12, %s849_s12  }
   0x4   : > { %s20_s18 = ssub.s32 %s641_s15, %s686_s17  ;;  %s23_s19 = sadd.s32 1, %s637_s14 }
   0x5   : > { %p21_p0 = scmp.eq.s32.totalorder %s20_s18, 0  ;;  %p30_p1 = scmp.ne.s32.totalorder %s637_s14, %s633_s13 }
   0x6   : > { %p31_p2 = scmp.eq.s32.totalorder %s641_s15, 0  ;;  %p36_p3 = scmp.ne.s32.totalorder %s633_s13, %s629_s12 }
   0x7   : > { %s696_s20 = scalar_select %p21_p0, %s637_s14, %s23_s19  }
   0x8   : > { %p32_p4 = por %p31_p2, %p30_p1  ;;  %p37_p5 = scmp.eq.s32.totalorder %s405_s16, 0 }
   0x9   : > { %p542_p6 = scmp.lt.s32.totalorder %s641_s15, 4  ;;  %s134_s22 = sand.u32 1, %s637_s14  }
   0xa   : > { %p701_p7 = por %p37_p5, %p36_p3  ;;  %s409_s23 = sshll.u32 %s134_s22, 6 }
   0xb   : > { %s419_s24 = sshll.u32 %s641_s15, 10  ;;  %s138_s28 = scalar_lea.vmem [#allocation2], %s409_s23 }
   0xc   : > { %s710_s27 = scalar_lea.hbm %s842_s0, %s419_s24  ;;  %s145_s29 = sshll.u32 %s138_s28, 4  ;;  %s712_s29 = int_to_ptr.vmem [resolvable:$true] %s145_s29 }
   0xd   : > { %p714_p8 = pnand %p542_p6, %p32_p4  ;;  %s719_s4 = scalar_lea.sflag [#allocation3], %s134_s22 }
   0xe   : > { %s577_s5 = scalar_lea.hbm %s710_s27, 1024  ;;  %s582_s8 = scalar_lea.hbm %s842_s0, 4096 }
   0xf   : > { %p578_p10 = scmp.ne.s32.totalorder %s710_s27, %s577_s5  ;;  %p579_p11 = pneg %p714_p8 }
  0x10   : > { %p583_p0 = scmp.lt.u32.totalorder %s710_s27, %s842_s0  ;;  %p584_p1 = scmp.lt.u32.totalorder %s582_s8, %s577_s5 }
  0x11   : > { %p580_p12 = pnand %p579_p11, %p578_p10  ;;  %p586_p3 = scmp.lt.u32.totalorder %s577_s5, %s710_s27 }
  0x12   : > { %p585_p2 = por %p584_p1, %p583_p0 }
  0x13   : > { %p581_p13 = pneg %p580_p12 }
  0x14   : > { %p587_p4 = por %p586_p3, %p585_p2 }
  0x16   : > { %p588_p5 = pnand %p587_p4, %p581_p13 }
  0x18   : > { %591 = shalt.err (!%p588_p5)
}
  0x19   : > { %s592_s11 = scalar_lea.vmem %s712_s29, 1024  ;;  %s643_s12 = smov [#allocation2]  }
  0x1a   : > { %p593_p6 = scmp.ne.s32.totalorder %s712_s29, %s592_s11  ;;  %s597_s18 = sshll.u32 %s643_s12, 4  ;;  %s598_s18 = int_to_ptr.vmem [resolvable:$false] %s597_s18 }
  0x1b   : > { %s599_s19 = scalar_lea.vmem %s598_s18, 2048  ;;  %p600_p9 = scmp.lt.s32.totalorder %s712_s29, %s598_s18 }
  0x1c   : > { %p595_p10 = pnand %p593_p6, %p579_p11  ;;  %p601_p0 = scmp.lt.s32.totalorder %s599_s19, %s592_s11 }
  0x1e   : > { %p596_p12 = pneg %p595_p10  ;;  %p602_p1 = por %p601_p0, %p600_p9 }
  0x20   : > { %p603_p2 = pnand %p602_p1, %p596_p12 }
  0x22   : > { %606 = shalt.err (!%p603_p2)
}
  0x23   : > { %s644_s22 = smov 128   ;;  %s645_s23 = smov 8  }
  0x24   : > { %541 = dma.hbm_to_vmem [thread:$0]  (!%p714_p8), %s710_s27, 1024, %s712_s29, %s719_s4, %s644_s22, %s644_s22, %s645_s23  }
  0x25   : > { %p153_p11 = scmp.lt.s32.totalorder %s641_s15, 5  ;;  %p848_p13 = scmp.ge.s32.totalorder %s641_s15, 1 }
  0x27   : > { %p154_p3 = pnand %p848_p13, %p153_p11 }
  0x28   : > { %s159_s24 = sand.u32 (!%p154_p3), 1, %s633_s13  }
  0x29   : > { %157 = sbr.rel (%p154_p3) target bundleno = 304 (0x130), region = 32  ;;  %s413_s25 = sshll.u32 (!%p154_p3), %s159_s24, 6 }
  0x2a   : > { %s160_s26 = scalar_lea.sflag (!%p154_p3), [#allocation3], %s159_s24  ;;  %s751_s28 = scalar_lea.vmem (!%p154_p3), [#allocation2], %s413_s25 }
  0x30   : > { %624 = dma.done.wait (%p701_p7), %s160_s26, 1024  }
  0x31   : > { %626 = vsyncadd (%p701_p7), %s160_s26, 4294966272  ;;  %v201_v0 = vld [vmem:[%s843_s1] sm:$0xff]  ;;  %v202_v1 = vld [vmem:[%s843_s1 + $0x8] sm:$0xff]  ;;  %s414_s12 = sshll.u32 %s405_s16, 3  ;;  %vm329_vm0 = vcmask 97280  }
  0x32   : > { %v203_v2 = vld [vmem:[%s843_s1 + $0x10] sm:$0xff]  ;;  %v488_v3 = vpack.c.bf16 %v202_v1, %v201_v0  ;;  %v204_v4 = vld [vmem:[%s843_s1 + $0x18] sm:$0xff]  ;;  %v205_v6 = vld [vmem:[%s843_s1 + $0x20] sm:$0xff]  ;;  %p188_p7 = scmp.lt.s32.totalorder %s414_s12, 31 }
  0x33   : > { %v492_v5 = vpack.c.bf16 %v204_v4, %v203_v2  ;;  %v206_v7 = vld [vmem:[%s843_s1 + $0x28] sm:$0xff]  ;;  %v193_v9 = vld [vmem:[%s751_s28] sm:$0xff]  ;;  %v207_v11 = vld [vmem:[%s843_s1 + $0x30] sm:$0xff] }
  0x34   : > { %489 = vmatprep.subr.bf16.mxu0 %v488_v3  ;;  %520 = vmatprep.subr.bf16.mxu1 %v488_v3  ;;  %v496_v8 = vpack.c.bf16 %v206_v7, %v205_v6  ;;  %v197_v10 = vld [vmem:[%s751_s28 + $0x20] sm:$0xff]  ;;  %v208_v12 = vld [vmem:[%s843_s1 + $0x38] sm:$0xff]  ;;  %v210_v15 = vld [vmem:[%s843_s1 + $0x48] sm:$0xff]  ;;  %s854_s12 = smov (!%p188_p7, %s414_s12), 31 }
  0x35   : > { %491 = vmatpush3.bf16.msra.mxu0 %v488_v3  ;;  %528 = vmatpush3.bf16.msra.mxu1 %v488_v3  ;;  %v500_v13 = vpack.c.bf16 %v208_v12, %v207_v11  ;;  %v209_v14 = vld [vmem:[%s843_s1 + $0x40] sm:$0xff]  ;;  %v211_v17 = vld [vmem:[%s843_s1 + $0x50] sm:$0xff]  ;;  %v212_v18 = vld [vmem:[%s843_s1 + $0x58] sm:$0xff]  ;;  %s415_s18 = sshll.u32 %s854_s12, 3 }
  0x36   : > { %493 = vmatprep.subr.bf16.mxu0 %v492_v5  ;;  %521 = vmatprep.subr.bf16.mxu1 %v492_v5  ;;  %v504_v16 = vpack.c.bf16 %v210_v15, %v209_v14  ;;  %v508_v19 = vpack.c.bf16 %v212_v18, %v211_v17  ;;  %v213_v20 = vld [vmem:[%s843_s1 + $0x60] sm:$0xff]  ;;  %v214_v21 = vld [vmem:[%s843_s1 + $0x68] sm:$0xff]  ;;  %v215_v23 = vld [vmem:[%s843_s1 + $0x70] sm:$0xff]  ;;  %s191_s25 = scalar_lea.vmem %s845_s3, %s415_s18 }
  0x37   : > { %476 = vmatprep.mubr.f32.mxu0 %v193_v9  ;;  %482 = vmatprep.mubr.f32.mxu1 %v197_v10  ;;  %v512_v22 = vpack.c.bf16 %v214_v21, %v213_v20  ;;  %v216_v24 = vld [vmem:[%s843_s1 + $0x78] sm:$0xff]  ;;  %v194_v26 = vld [vmem:[%s751_s28 + $0x8] sm:$0xff]  ;;  %v195_v28 = vld [vmem:[%s751_s28 + $0x10] sm:$0xff] }
  0x38   : > { %v516_v25 = vpack.c.bf16 %v216_v24, %v215_v23  ;;  %v198_v27 = vld [vmem:[%s751_s28 + $0x28] sm:$0xff]  ;;  %v199_v29 = vld [vmem:[%s751_s28 + $0x30] sm:$0xff]  ;;  %v196_v30 = vld [vmem:[%s751_s28 + $0x18] sm:$0xff] }
  0x39   : > { %495 = vmatpush3.bf16.msra.mxu0 %v492_v5  ;;  %529 = vmatpush3.bf16.msra.mxu1 %v492_v5  ;;  %v200_v31 = vld [vmem:[%s751_s28 + $0x38] sm:$0xff]  ;;  %v416_v32 = vld [vmem:[%s844_s2] ss:$0 sm:$0xff] }
  0x3a   : > { %497 = vmatprep.subr.bf16.mxu0 %v496_v8  ;;  %522 = vmatprep.subr.bf16.mxu1 %v496_v8 }
  0x3d   : > { %499 = vmatpush3.bf16.msra.mxu0 %v496_v8  ;;  %530 = vmatpush3.bf16.msra.mxu1 %v496_v8 }
  0x3e   : > { %501 = vmatprep.subr.bf16.mxu0 %v500_v13  ;;  %523 = vmatprep.subr.bf16.mxu1 %v500_v13 }
  0x41   : > { %503 = vmatpush3.bf16.msra.mxu0 %v500_v13  ;;  %531 = vmatpush3.bf16.msra.mxu1 %v500_v13 }
  0x42   : > { %505 = vmatprep.subr.bf16.mxu0 %v504_v16  ;;  %524 = vmatprep.subr.bf16.mxu1 %v504_v16 }
  0x45   : > { %507 = vmatpush3.bf16.msra.mxu0 %v504_v16  ;;  %532 = vmatpush3.bf16.msra.mxu1 %v504_v16 }
  0x46   : > { %509 = vmatprep.subr.bf16.mxu0 %v508_v19  ;;  %525 = vmatprep.subr.bf16.mxu1 %v508_v19 }
  0x49   : > { %511 = vmatpush3.bf16.msra.mxu0 %v508_v19  ;;  %533 = vmatpush3.bf16.msra.mxu1 %v508_v19 }
  0x4a   : > { %513 = vmatprep.subr.bf16.mxu0 %v512_v22  ;;  %526 = vmatprep.subr.bf16.mxu1 %v512_v22 }
  0x4d   : > { %515 = vmatpush3.bf16.msra.mxu0 %v512_v22  ;;  %534 = vmatpush3.bf16.msra.mxu1 %v512_v22 }
  0x4e   : > { %517 = vmatprep.subr.bf16.mxu0 %v516_v25  ;;  %527 = vmatprep.subr.bf16.mxu1 %v516_v25 }
  0x51   : > { %519 = vmatpush3.bf16.msra.mxu0 %v516_v25  ;;  %535 = vmatpush3.bf16.msra.mxu1 %v516_v25 }
  0x54   : > { %477 = vmatmul.mubr.f32.vlgmr.msra.gmra.mrb[0].mxu0 %v194_v26  ;;  %483 = vmatmul.mubr.f32.vlgmr.msra.gmra.mrb[0].mxu1 %v198_v27 }
  0x55   : > { %479 = vmatprep.mubr.f32.mxu0 %v195_v28  ;;  %485 = vmatprep.mubr.f32.mxu1 %v199_v29 }
  0x58   : > { %480 = vmatmul.mubr.f32.gmra.mrb[2].mxu0 %v196_v30  ;;  %486 = vmatmul.mubr.f32.gmra.mrb[2].mxu1 %v200_v31 }
 0x127   : > { %v478_v33 = vpop.f32.mrb[0].mxu0  ;;  %v484_v34 = vpop.f32.mrb[0].mxu1 }
 0x128   : > { %v296_v35 = vadd.f32 %v478_v33, %v416_v32  ;;  %v316_v36 = vadd.f32 %v484_v34, %v416_v32  ;;  %v290_v37 = vpop.f32.mrb[1].mxu0  ;;  %v310_v38 = vpop.f32.mrb[1].mxu1 }
 0x129   : > { %v291_v39 = vadd.f32 %v416_v32, %v290_v37  ;;  %v311_v40 = vadd.f32 %v416_v32, %v310_v38 }
 0x12a   : > { %331 = vst.msk [vmem:[%s191_s25 + $0x8] sm:$0xff] %vm329_vm0, %v296_v35  ;;  %335 = vst.msk [vmem:[%s191_s25 + $0x28] sm:$0xff] %vm329_vm0, %v316_v36 }
 0x12b   : > { %330 = vst.msk [vmem:[%s191_s25] sm:$0xff] %vm329_vm0, %v291_v39  ;;  %334 = vst.msk [vmem:[%s191_s25 + $0x20] sm:$0xff] %vm329_vm0, %v311_v40  ;;  %v481_v41 = vpop.f32.mrb[2].mxu0  ;;  %v487_v42 = vpop.f32.mrb[2].mxu1 }
 0x12c   : > { %v306_v43 = vadd.f32 %v481_v41, %v416_v32  ;;  %v326_v44 = vadd.f32 %v487_v42, %v416_v32  ;;  %v300_v45 = vpop.f32.mrb[3].mxu0  ;;  %v320_v46 = vpop.f32.mrb[3].mxu1 }
 0x12d   : > { %v301_v47 = vadd.f32 %v416_v32, %v300_v45  ;;  %v321_v48 = vadd.f32 %v416_v32, %v320_v46 }
 0x12e   : > { %333 = vst.msk [vmem:[%s191_s25 + $0x18] sm:$0xff] %vm329_vm0, %v306_v43  ;;  %337 = vst.msk [vmem:[%s191_s25 + $0x38] sm:$0xff] %vm329_vm0, %v326_v44 }
 0x12f   : > { %332 = vst.msk [vmem:[%s191_s25 + $0x10] sm:$0xff] %vm329_vm0, %v301_v47  ;;  %336 = vst.msk [vmem:[%s191_s25 + $0x30] sm:$0xff] %vm329_vm0, %v321_v48 }
 0x130 PF: > { %p13_p8 = scmp.ge.s32.totalorder %s686_s17, 6   ;;  %s849_s12 = smov %s633_s13 }
 0x131   : > { %s850_s13 = smov %s637_s14  ;;  %s851_s14 = smov %s696_s20 }
 0x132   : > { %s852_s15 = smov %s686_s17  ;;  %15 = sbr.rel (!%p13_p8) target bundleno = 3 (0x3), region = 72 }
 0x139   :  { %360 = vsyncpa [#allocation3], 1 }
 0x13a   :  { %362 = vsyncpa [#allocation3 + $0x1], 1 }

</bundles_post_ra>
